<compile_context>
chip_gen: v7x
topology: tpu7x:2x2x1
jax: 0.10.0
libtpu: 0.0.40
codegen_flags: <defaults>
</compile_context>

<pallas_src>
import jax
import jax.numpy as jnp
from jax.experimental import pallas as pl
from jax.experimental.pallas import tpu as pltpu

HIDDEN1 = 64
HIDDEN2 = 32
LN_EPS = 1e-5  # PyTorch nn.LayerNorm default


def _round_up(n, m):
    return ((n + m - 1) // m) * m


def _layernorm(h, gamma, beta):
    mu = jnp.mean(h, axis=-1, keepdims=True)
    var = jnp.mean((h - mu) ** 2, axis=-1, keepdims=True)
    return (h - mu) * jax.lax.rsqrt(var + LN_EPS) * gamma + beta


def _gelu_exact(h):
    # nn.GELU() default = exact erf GELU (kept for PyTorch parity).
    # TODO(synk): optional tanh-approx GELU (rides the EUP slot) if profiles
    # ever show the LN+GELU tail VALU-bound at small D.
    return 0.5 * h * (1.0 + jax.lax.erf(h * 0.7071067811865475))


def _resident_spec(shape, index_map):
    """BlockSpec for a VMEM-resident operand (constant index_map).

    Single-buffered via pl.Buffered(1); falls back gracefully if the installed
    BlockSpec does not take a pipeline_mode kwarg.
    """
    buffered = getattr(pl, "Buffered", None)
    if buffered is not None:
        try:
            return pl.BlockSpec(shape, index_map, pipeline_mode=buffered(1))
        except TypeError:
            pass
    return pl.BlockSpec(shape, index_map)


def _vmem_budget():
    cap = None
    try:
        info = pltpu.get_tpu_info()
        cap = getattr(info, "vmem_capacity_bytes", None)
    except Exception:
        cap = None
    if not cap:
        cap = 64 << 20  # conservative fallback: v7x per-TensorCore VMEM
    return max(32 << 20, int(cap) - (12 << 20))  # leave compiler/internal headroom


def _choose_tk(d_pad, itemsize, block_budget):
    """Largest 128-multiple divisor of d_pad whose 2x-buffered column block fits."""
    best = 128
    for cand in range(128, d_pad + 1, 128):
        if d_pad % cand == 0 and 2 * d_pad * cand * itemsize <= block_budget:
            best = cand
    return best


# ---------------------------------------------------------------------------
# Kernel (trace-time specialized: fully-resident fused weight vs column-tiled)
# ---------------------------------------------------------------------------
def _build_kernel(*, d_pad, tk, num_k, tb):
    tiled = num_k > 1
    nw = (d_pad // tk) if tiled else 1  # number of W_sym column blocks

    def kernel(x_ref, wcat_ref, w2_ref, pk1_ref, pk2_ref, out_ref, quad_acc):
        k = pl.program_id(1)

        # One MXU pass over this step's weight columns (f32 accumulation).
        fused = jnp.dot(x_ref[...], wcat_ref[...],
                        preferred_element_type=jnp.float32)

        if tiled:
            @pl.when(k == 0)
            def _init():
                quad_acc[...] = jnp.zeros_like(quad_acc)

            # Quadratic contribution of this column block.  The final (w1)
            # block is gated out with a 0/1 scalar, so no branch and no
            # out-of-range slice is ever taken.
            start = pl.multiple_of(jnp.minimum(k, nw - 1) * tk, 128)
            xs = x_ref[:, pl.ds(start, tk)].astype(jnp.float32)
            gate = (k < nw).astype(jnp.float32)
            quad_acc[...] += gate * jnp.sum(xs * fused, axis=1, keepdims=True)
        else:
            xf = x_ref[...].astype(jnp.float32)
            quad_acc[...] = jnp.sum(xf * fused[:, :d_pad], axis=1, keepdims=True)

        def tail():
            # Post-matmul elementwise math stays f32 (v5e VPU has no bf16).
            h1 = fused[:, :HIDDEN1] if tiled else fused[:, d_pad:d_pad + HIDDEN1]
            h = h1 + pk1_ref[0:1, :]
            h = _gelu_exact(_layernorm(h, pk1_ref[1:2, :], pk1_ref[2:3, :]))
            h = jnp.dot(h.astype(w2_ref.dtype), w2_ref[...],
                        preferred_element_type=jnp.float32) + pk2_ref[0:1, :]
            h = _gelu_exact(_layernorm(h, pk2_ref[1:2, :], pk2_ref[2:3, :]))
            # Linear(32, 1) as a VPU multiply + lane reduction (no 1-wide matmul).
            mlp = jnp.sum(h * pk2_ref[3:4, :], axis=-1, keepdims=True)   # (tb, 1)
            res = quad_acc[...] + mlp + pk2_ref[4:5, 0:1]                # (tb, 1)
            # Lane-dense writeback: the (tb,1)->(1,1,tb) relayout rides the XLU.
            out_ref[...] = jnp.reshape(res, (1, 1, tb))

        if tiled:
            pl.when(k == num_k - 1)(tail)
        else:
            tail()

    return kernel


# ---------------------------------------------------------------------------
# Param prep (shared by wrapper and numerics-matched reference)
# ---------------------------------------------------------------------------
def _prepare_weights(params, d_pad, w1_cols, mm_dtype):
    D = params["W"].shape[0]
    W_sym = 0.5 * (params["W"] + params["W"].T)                      # symmetrize once
    W_sym = jnp.pad(W_sym, ((0, d_pad - D), (0, d_pad - D)))          # lane-align
    w1 = jnp.pad(params["w1"], ((0, d_pad - D), (0, w1_cols - HIDDEN1)))
    wcat = jnp.concatenate([W_sym, w1], axis=1).astype(mm_dtype)      # (d_pad, d_pad+w1_cols)
    w2 = params["w2"].astype(mm_dtype)                                # (64, 32)
    pk1 = jnp.concatenate([params["b1"], params["g1"], params["be1"]], axis=0)  # (3, 64)
    b3_eff = (params["b3"] + params["b"]).reshape(1, 1)               # fold scalar b
    pk2 = jnp.concatenate(
        [params["b2"], params["g2"], params["be2"],
         params["w3"].reshape(1, HIDDEN2),
         jnp.broadcast_to(b3_eff, (1, HIDDEN2))], axis=0)             # (5, 32)
    return wcat, w2, pk1, pk2


def _plan(B, D, use_bf16, tile_b, vmem_limit_bytes, force_tk):
    d_pad = _round_up(max(D, 1), 128)
    mm_dtype = jnp.bfloat16 if use_bf16 else jnp.float32
    mm_size = 2 if use_bf16 else 4
    budget = int(vmem_limit_bytes) if vmem_limit_bytes else _vmem_budget()

    # How to hold the fused weight [W_sym | w1] in VMEM.
    wcat_resident_bytes = d_pad * (d_pad + 128) * mm_size
    if force_tk is not None:
        tk = int(force_tk)
        if tk % 128 != 0 or d_pad % tk != 0:
            raise ValueError("force_tk must be a 128-multiple divisor of padded D")
        num_k = d_pad // tk + 1
    elif wcat_resident_bytes <= 0.6 * budget:
        tk = d_pad + 128          # single fully-resident block
        num_k = 1
    else:
        tk = _choose_tk(d_pad, mm_size, budget // 3)
        num_k = d_pad // tk + 1
    w1_cols = 128 if num_k == 1 else tk
    block_w = d_pad + 128 if num_k == 1 else tk

    # Batch tile: biggest that fits the remaining VMEM budget.
    # TODO(synk): for extreme D where even one (8, d_pad) x row-tile plus a
    # 128-wide weight column block overflows VMEM, also tile the contraction dim.
    wcat_vmem = d_pad * block_w * mm_size * (1 if num_k == 1 else 2)
    if tile_b is None:
        per_row = (2 * d_pad * mm_size               # double-buffered x tile
                   + block_w * 4                     # f32 fused intermediate
                   + 2 * max(block_w, d_pad) * 4     # f32 upcast / product temps
                   + 2048)                           # quad_acc + output rows + slack
        avail = budget - wcat_vmem - (1 << 20) - (6 << 20)
        tb = 8
        for cand in (2048, 1024, 512, 256, 128, 64, 32, 16, 8):
            if cand * per_row <= avail:
                tb = cand
                break
    else:
        tb = int(tile_b)
    tb = _round_up(max(8, min(tb, _round_up(B, 8))), 8)
    return d_pad, mm_dtype, tk, num_k, w1_cols, tb, budget


# ---------------------------------------------------------------------------
# Wrapper
# ---------------------------------------------------------------------------
def quadmlp_forward(x, params, *, tile_b=None, use_bf16=True,
                    vmem_limit_bytes=None, force_tk=None):
    """x: (B, D) float32. Returns (B,) float32."""
    B, D = x.shape
    d_pad, mm_dtype, tk, num_k, w1_cols, tb, budget = _plan(
        B, D, use_bf16, tile_b, vmem_limit_bytes, force_tk)

    wcat, w2, pk1, pk2 = _prepare_weights(params, d_pad, w1_cols, mm_dtype)

    # Single (optional) prep pass over x: pad the feature dim to a 128-lane
    # boundary and/or cast to bf16 for half-width streaming.  NO batch padding:
    # the final partial batch tile overhangs; its rows land in the tail of that
    # tile's own output row and are sliced off below (no aliasing of valid rows).
    x_in = x
    if d_pad != D:
        x_in = jnp.pad(x_in, ((0, 0), (0, d_pad - D)))
    if x_in.dtype != mm_dtype:
        x_in = x_in.astype(mm_dtype)

    num_b = pl.cdiv(B, tb)
    kernel = _build_kernel(d_pad=d_pad, tk=tk, num_k=num_k, tb=tb)

    if num_k == 1:
        wcat_spec = _resident_spec((d_pad, d_pad + w1_cols), lambda i, k: (0, 0))
    else:
        wcat_spec = pl.BlockSpec((d_pad, tk), lambda i, k: (0, k))   # column-tiled

    in_specs = [
        pl.BlockSpec((tb, d_pad), lambda i, k: (i, 0)),              # x: streamed
        wcat_spec,
        _resident_spec((HIDDEN1, HIDDEN2), lambda i, k: (0, 0)),     # w2
        _resident_spec((3, HIDDEN1), lambda i, k: (0, 0)),           # b1/g1/be1 pack
        _resident_spec((5, HIDDEN2), lambda i, k: (0, 0)),           # b2/g2/be2/w3/b3 pack
    ]

    out = pl.pallas_call(
        kernel,
        out_shape=jax.ShapeDtypeStruct((num_b, 1, tb), jnp.float32),
        grid_spec=pltpu.PrefetchScalarGridSpec(
            num_scalar_prefetch=0,
            grid=(num_b, num_k),
            in_specs=in_specs,
            out_specs=pl.BlockSpec((1, 1, tb), lambda i, k: (i, 0, 0)),  # lane-dense
            scratch_shapes=[pltpu.VMEM((tb, 1), jnp.float32)],           # quad accumulator
        ),
        compiler_params=pltpu.CompilerParams(
            dimension_semantics=("parallel", "arbitrary"),
            vmem_limit_bytes=int(budget),
        ),
    )(x_in, wcat, w2, pk1, pk2)

    return out.reshape(-1)[:B]


# ---------------------------------------------------------------------------
# Init + references
# ---------------------------------------------------------------------------
def init_params(key, input_dim):
    ks = jax.random.split(key, 7)
    scale = 1.0 / jnp.sqrt(jnp.float32(input_dim))
    W = jax.random.normal(ks[0], (input_dim, input_dim), jnp.float32) * scale
    W = 0.5 * (W + W.T)  # symmetrized at init, like the PyTorch module
    return {
        "W": W,
        "b": jnp.zeros((1,), jnp.float32),
        "w1": jax.random.normal(ks[1], (input_dim, HIDDEN1), jnp.float32) * scale,
        "b1": jax.random.normal(ks[2], (1, HIDDEN1), jnp.float32) * 0.01,
        "g1": jnp.ones((1, HIDDEN1), jnp.float32),
        "be1": jnp.zeros((1, HIDDEN1), jnp.float32),
        "w2": jax.random.normal(ks[3], (HIDDEN1, HIDDEN2), jnp.float32)
        / jnp.sqrt(jnp.float32(HIDDEN1)),
        "b2": jax.random.normal(ks[4], (1, HIDDEN2), jnp.float32) * 0.01,
        "g2": jnp.ones((1, HIDDEN2), jnp.float32),
        "be2": jnp.zeros((1, HIDDEN2), jnp.float32),
        "w3": jax.random.normal(ks[5], (HIDDEN2, 1), jnp.float32)
        / jnp.sqrt(jnp.float32(HIDDEN2)),
        "b3": jax.random.normal(ks[6], (1, 1), jnp.float32) * 0.01,
    }


def reference_forward(x, p):
    """Pure-JAX f32 reference mirroring the PyTorch forward (eval mode)."""
    W_sym = 0.5 * (p["W"] + p["W"].T)
    quad = jnp.sum(x * (x @ W_sym), axis=1)
    h = x @ p["w1"] + p["b1"]
    h = _gelu_exact(_layernorm(h, p["g1"], p["be1"]))
    h = h @ p["w2"] + p["b2"]
    h = _gelu_exact(_layernorm(h, p["g2"], p["be2"]))
    mlp = (h @ p["w3"] + p["b3"])[:, 0]
    return quad + mlp + p["b"][0]


def matched_reference(x, params, *, use_bf16=True):
    """Pure-JAX reference using the same padded/fused weights and dtype casts."""
    B, D = x.shape
    d_pad = _round_up(max(D, 1), 128)
    mm_dtype = jnp.bfloat16 if use_bf16 else jnp.float32
    wcat, w2, pk1, pk2 = _prepare_weights(params, d_pad, 128, mm_dtype)
    xp = jnp.pad(x, ((0, 0), (0, d_pad - D))).astype(mm_dtype)
    fused = jnp.dot(xp, wcat, preferred_element_type=jnp.float32)
    quad = jnp.sum(xp.astype(jnp.float32) * fused[:, :d_pad], axis=1, keepdims=True)
    h = fused[:, d_pad:d_pad + HIDDEN1] + pk1[0:1]
    h = _gelu_exact(_layernorm(h, pk1[1:2], pk1[2:3]))
    h = jnp.dot(h.astype(mm_dtype), w2, preferred_element_type=jnp.float32) + pk2[0:1]
    h = _gelu_exact(_layernorm(h, pk2[1:2], pk2[2:3]))
    mlp = jnp.sum(h * pk2[3:4], axis=-1, keepdims=True)
    return (quad + mlp + pk2[4:5, 0:1])[:, 0]


def _check(name, got, want, tol):
    got = jnp.asarray(got, jnp.float32)
    want = jnp.asarray(want, jnp.float32)
    err = float(jnp.max(jnp.abs(got - want)))
    scale = float(jnp.max(jnp.abs(want))) + 1.0
    if not err <= tol * scale:
        raise AssertionError(f"{name}: max_err={err:.4g} > {tol * scale:.4g}")


if __name__ == "__main__":
    key = jax.random.PRNGKey(0)
    kx1, kp1, kx2, kp2 = jax.random.split(key, 4)

    # --- Test 1: tiny shapes, f32, fully-resident fused weight ---------------
    B1, D1 = 8, 16
    x1 = jax.random.normal(kx1, (B1, D1), jnp.float32)
    p1 = init_params(kp1, D1)
    out1 = jax.block_until_ready(quadmlp_forward(x1, p1, use_bf16=False))
    assert out1.shape == (B1,)
    _check("f32-resident", out1, reference_forward(x1, p1), 2e-2)

    # --- Test 2: bf16 streaming path + row-overhang batch tile ---------------
    B2, D2 = 300, 256
    x2 = jax.random.normal(kx2, (B2, D2), jnp.float32)
    p2 = init_params(kp2, D2)
    out2 = jax.block_until_ready(quadmlp_forward(x2, p2, use_bf16=True))
    assert out2.shape == (B2,)
    _check("bf16-resident-vs-matched", out2, matched_reference(x2, p2, use_bf16=True), 2e-2)
    _check("bf16-resident-vs-f32ref", out2, reference_forward(x2, p2), 8e-2)

    # --- Test 3: column-tiled fused weight (v7x big-D path), f32, partial tile
    out3 = jax.block_until_ready(
        quadmlp_forward(x2[:40], p2, use_bf16=False, tile_b=32, force_tk=128))
    assert out3.shape == (40,)
    _check("f32-column-tiled", out3, reference_forward(x2[:40], p2), 2e-2)

    print("KERNEL_OK")
</pallas_src>

<mosaic_0001>
module attributes {stable_mosaic.version = 11 : i64} {
  func.func @kernel(%arg0: i32, %arg1: i32, %arg2: memref<8x128xf32, #tpu.memory_space<vmem>>, %arg3: memref<128x256xf32, #tpu.memory_space<vmem>>, %arg4: memref<64x32xf32, #tpu.memory_space<vmem>>, %arg5: memref<3x64xf32, #tpu.memory_space<vmem>>, %arg6: memref<5x32xf32, #tpu.memory_space<vmem>>, %arg7: memref<1x1x8xf32, #tpu.memory_space<vmem>>, %arg8: memref<8x1xf32, #tpu.memory_space<vmem>>) attributes {dimension_semantics = [#tpu.dimension_semantics<parallel>, #tpu.dimension_semantics<arbitrary>], iteration_bounds = array<i64: 1, 1>, scalar_prefetch = 0 : i64, scratch_operands = 1 : i64, tpu.core_type = #tpu.core_type<tc>, window_params = [{transform_indices = @transform_0, window_bounds = array<i64: 8, 128>}, {pipeline_mode = #tpu.pipeline_mode<synchronous>, transform_indices = @transform_1, window_bounds = array<i64: 128, 256>}, {pipeline_mode = #tpu.pipeline_mode<synchronous>, transform_indices = @transform_2, window_bounds = array<i64: 64, 32>}, {pipeline_mode = #tpu.pipeline_mode<synchronous>, transform_indices = @transform_3, window_bounds = array<i64: 3, 64>}, {pipeline_mode = #tpu.pipeline_mode<synchronous>, transform_indices = @transform_4, window_bounds = array<i64: 5, 32>}, {transform_indices = @transform_5, window_bounds = array<i64: 1, 1, 8>}]} {
    %c0 = arith.constant 0 : index
    %c0_0 = arith.constant 0 : index
    %0 = vector.load %arg2[%c0, %c0_0] : memref<8x128xf32, #tpu.memory_space<vmem>>, vector<8x128xf32>
    %c0_1 = arith.constant 0 : index
    %c0_2 = arith.constant 0 : index
    %1 = vector.load %arg3[%c0_1, %c0_2] : memref<128x256xf32, #tpu.memory_space<vmem>>, vector<128x256xf32>
    %cst = arith.constant dense<0.000000e+00> : vector<8x256xf32>
    %2 = tpu.matmul %0, %1, %cst {dimension_numbers = #tpu.dot_dimension_numbers<[1], [0], [0], [1], [0, 0, 1, 1], [], []>} : vector<8x128xf32>, vector<128x256xf32>, vector<8x256xf32> -> vector<8x256xf32>
    %c0_3 = arith.constant 0 : index
    %c0_4 = arith.constant 0 : index
    %3 = vector.load %arg2[%c0_3, %c0_4] : memref<8x128xf32, #tpu.memory_space<vmem>>, vector<8x128xf32>
    %4 = vector.extract_strided_slice %2 {offsets = [0, 0], sizes = [8, 128], strides = [1, 1]} : vector<8x256xf32> to vector<8x128xf32>
    %5 = arith.mulf %3, %4 : vector<8x128xf32>
    %cst_5 = arith.constant dense<0.000000e+00> : vector<8xf32>
    %6 = vector.multi_reduction <add>, %5, %cst_5 [1] : vector<8x128xf32> to vector<8xf32>
    %7 = vector.shape_cast %6 : vector<8xf32> to vector<8x1xf32>
    %c0_6 = arith.constant 0 : index
    %c0_7 = arith.constant 0 : index
    %8 = vector.load %arg8[%c0_6, %c0_7] : memref<8x1xf32, #tpu.memory_space<vmem>>, vector<8x1xf32>
    tpu.vector_store %arg8[%c0_6, %c0_7], %7 {strides = array<i32>} : memref<8x1xf32, #tpu.memory_space<vmem>>, vector<8x1xf32>,
    %9 = vector.extract_strided_slice %2 {offsets = [0, 128], sizes = [8, 64], strides = [1, 1]} : vector<8x256xf32> to vector<8x64xf32>
    %c0_8 = arith.constant 0 : index
    %c0_9 = arith.constant 0 : index
    %10 = vector.load %arg5[%c0_8, %c0_9] : memref<3x64xf32, #tpu.memory_space<vmem>>, vector<1x64xf32>
    %11 = vector.broadcast %10 : vector<1x64xf32> to vector<8x64xf32>
    %12 = arith.addf %9, %11 : vector<8x64xf32>
    %c1 = arith.constant 1 : index
    %c0_10 = arith.constant 0 : index
    %13 = vector.load %arg5[%c1, %c0_10] : memref<3x64xf32, #tpu.memory_space<vmem>>, vector<1x64xf32>
    %c2 = arith.constant 2 : index
    %c0_11 = arith.constant 0 : index
    %14 = vector.load %arg5[%c2, %c0_11] : memref<3x64xf32, #tpu.memory_space<vmem>>, vector<1x64xf32>
    %cst_12 = arith.constant dense<0.000000e+00> : vector<8xf32>
    %15 = vector.multi_reduction <add>, %12, %cst_12 [1] : vector<8x64xf32> to vector<8xf32>
    %16 = vector.shape_cast %15 : vector<8xf32> to vector<8x1xf32>
    %cst_13 = arith.constant 6.400000e+01 : f32
    %17 = vector.broadcast %cst_13 : f32 to vector<8x1xf32>
    %18 = arith.divf %16, %17 : vector<8x1xf32>
    %19 = vector.broadcast %18 : vector<8x1xf32> to vector<8x64xf32>
    %20 = arith.subf %12, %19 : vector<8x64xf32>
    %21 = arith.mulf %20, %20 : vector<8x64xf32>
    %cst_14 = arith.constant dense<0.000000e+00> : vector<8xf32>
    %22 = vector.multi_reduction <add>, %21, %cst_14 [1] : vector<8x64xf32> to vector<8xf32>
    %23 = vector.shape_cast %22 : vector<8xf32> to vector<8x1xf32>
    %cst_15 = arith.constant 6.400000e+01 : f32
    %24 = vector.broadcast %cst_15 : f32 to vector<8x1xf32>
    %25 = arith.divf %23, %24 : vector<8x1xf32>
    %26 = vector.broadcast %18 : vector<8x1xf32> to vector<8x64xf32>
    %27 = arith.subf %12, %26 : vector<8x64xf32>
    %cst_16 = arith.constant 9.99999974E-6 : f32
    %28 = vector.broadcast %cst_16 : f32 to vector<8x1xf32>
    %29 = arith.addf %25, %28 : vector<8x1xf32>
    %30 = math.rsqrt %29 : vector<8x1xf32>
    %31 = vector.broadcast %30 : vector<8x1xf32> to vector<8x64xf32>
    %32 = arith.mulf %27, %31 : vector<8x64xf32>
    %33 = vector.broadcast %13 : vector<1x64xf32> to vector<8x64xf32>
    %34 = arith.mulf %32, %33 : vector<8x64xf32>
    %35 = vector.broadcast %14 : vector<1x64xf32> to vector<8x64xf32>
    %36 = arith.addf %34, %35 : vector<8x64xf32>
    %cst_17 = arith.constant 5.000000e-01 : f32
    %37 = vector.broadcast %cst_17 : f32 to vector<8x64xf32>
    %38 = arith.mulf %37, %36 : vector<8x64xf32>
    %cst_18 = arith.constant 0.707106769 : f32
    %39 = vector.broadcast %cst_18 : f32 to vector<8x64xf32>
    %40 = arith.mulf %36, %39 : vector<8x64xf32>
    %41 = math.erf %40 : vector<8x64xf32>
    %cst_19 = arith.constant 1.000000e+00 : f32
    %42 = vector.broadcast %cst_19 : f32 to vector<8x64xf32>
    %43 = arith.addf %42, %41 : vector<8x64xf32>
    %44 = arith.mulf %38, %43 : vector<8x64xf32>
    %c0_20 = arith.constant 0 : index
    %c0_21 = arith.constant 0 : index
    %45 = vector.load %arg4[%c0_20, %c0_21] : memref<64x32xf32, #tpu.memory_space<vmem>>, vector<64x32xf32>
    %cst_22 = arith.constant dense<0.000000e+00> : vector<8x32xf32>
    %46 = tpu.matmul %44, %45, %cst_22 {dimension_numbers = #tpu.dot_dimension_numbers<[1], [0], [0], [1], [0, 0, 1, 1], [], []>} : vector<8x64xf32>, vector<64x32xf32>, vector<8x32xf32> -> vector<8x32xf32>
    %c0_23 = arith.constant 0 : index
    %c0_24 = arith.constant 0 : index
    %47 = vector.load %arg6[%c0_23, %c0_24] : memref<5x32xf32, #tpu.memory_space<vmem>>, vector<1x32xf32>
    %48 = vector.broadcast %47 : vector<1x32xf32> to vector<8x32xf32>
    %49 = arith.addf %46, %48 : vector<8x32xf32>
    %c1_25 = arith.constant 1 : index
    %c0_26 = arith.constant 0 : index
    %50 = vector.load %arg6[%c1_25, %c0_26] : memref<5x32xf32, #tpu.memory_space<vmem>>, vector<1x32xf32>
    %c2_27 = arith.constant 2 : index
    %c0_28 = arith.constant 0 : index
    %51 = vector.load %arg6[%c2_27, %c0_28] : memref<5x32xf32, #tpu.memory_space<vmem>>, vector<1x32xf32>
    %cst_29 = arith.constant dense<0.000000e+00> : vector<8xf32>
    %52 = vector.multi_reduction <add>, %49, %cst_29 [1] : vector<8x32xf32> to vector<8xf32>
    %53 = vector.shape_cast %52 : vector<8xf32> to vector<8x1xf32>
    %cst_30 = arith.constant 3.200000e+01 : f32
    %54 = vector.broadcast %cst_30 : f32 to vector<8x1xf32>
    %55 = arith.divf %53, %54 : vector<8x1xf32>
    %56 = vector.broadcast %55 : vector<8x1xf32> to vector<8x32xf32>
    %57 = arith.subf %49, %56 : vector<8x32xf32>
    %58 = arith.mulf %57, %57 : vector<8x32xf32>
    %cst_31 = arith.constant dense<0.000000e+00> : vector<8xf32>
    %59 = vector.multi_reduction <add>, %58, %cst_31 [1] : vector<8x32xf32> to vector<8xf32>
    %60 = vector.shape_cast %59 : vector<8xf32> to vector<8x1xf32>
    %cst_32 = arith.constant 3.200000e+01 : f32
    %61 = vector.broadcast %cst_32 : f32 to vector<8x1xf32>
    %62 = arith.divf %60, %61 : vector<8x1xf32>
    %63 = vector.broadcast %55 : vector<8x1xf32> to vector<8x32xf32>
    %64 = arith.subf %49, %63 : vector<8x32xf32>
    %cst_33 = arith.constant 9.99999974E-6 : f32
    %65 = vector.broadcast %cst_33 : f32 to vector<8x1xf32>
    %66 = arith.addf %62, %65 : vector<8x1xf32>
    %67 = math.rsqrt %66 : vector<8x1xf32>
    %68 = vector.broadcast %67 : vector<8x1xf32> to vector<8x32xf32>
    %69 = arith.mulf %64, %68 : vector<8x32xf32>
    %70 = vector.broadcast %50 : vector<1x32xf32> to vector<8x32xf32>
    %71 = arith.mulf %69, %70 : vector<8x32xf32>
    %72 = vector.broadcast %51 : vector<1x32xf32> to vector<8x32xf32>
    %73 = arith.addf %71, %72 : vector<8x32xf32>
    %cst_34 = arith.constant 5.000000e-01 : f32
    %74 = vector.broadcast %cst_34 : f32 to vector<8x32xf32>
    %75 = arith.mulf %74, %73 : vector<8x32xf32>
    %cst_35 = arith.constant 0.707106769 : f32
    %76 = vector.broadcast %cst_35 : f32 to vector<8x32xf32>
    %77 = arith.mulf %73, %76 : vector<8x32xf32>
    %78 = math.erf %77 : vector<8x32xf32>
    %cst_36 = arith.constant 1.000000e+00 : f32
    %79 = vector.broadcast %cst_36 : f32 to vector<8x32xf32>
    %80 = arith.addf %79, %78 : vector<8x32xf32>
    %81 = arith.mulf %75, %80 : vector<8x32xf32>
    %c3 = arith.constant 3 : index
    %c0_37 = arith.constant 0 : index
    %82 = vector.load %arg6[%c3, %c0_37] : memref<5x32xf32, #tpu.memory_space<vmem>>, vector<1x32xf32>
    %83 = vector.broadcast %82 : vector<1x32xf32> to vector<8x32xf32>
    %84 = arith.mulf %81, %83 : vector<8x32xf32>
    %cst_38 = arith.constant dense<0.000000e+00> : vector<8xf32>
    %85 = vector.multi_reduction <add>, %84, %cst_38 [1] : vector<8x32xf32> to vector<8xf32>
    %86 = vector.shape_cast %85 : vector<8xf32> to vector<8x1xf32>
    %c0_39 = arith.constant 0 : index
    %c0_40 = arith.constant 0 : index
    %87 = vector.load %arg8[%c0_39, %c0_40] : memref<8x1xf32, #tpu.memory_space<vmem>>, vector<8x1xf32>
    %88 = arith.addf %87, %86 : vector<8x1xf32>
    %c4 = arith.constant 4 : index
    %c0_41 = arith.constant 0 : index
    %89 = vector.load %arg6[%c4, %c0_41] : memref<5x32xf32, #tpu.memory_space<vmem>>, vector<1x1xf32>
    %90 = vector.broadcast %89 : vector<1x1xf32> to vector<8x1xf32>
    %91 = arith.addf %88, %90 : vector<8x1xf32>
    %92 = vector.shape_cast %91 : vector<8x1xf32> to vector<1x1x8xf32>
    %c0_42 = arith.constant 0 : index
    %c0_43 = arith.constant 0 : index
    %c0_44 = arith.constant 0 : index
    %93 = vector.load %arg7[%c0_42, %c0_43, %c0_44] : memref<1x1x8xf32, #tpu.memory_space<vmem>>, vector<1x1x8xf32>
    tpu.vector_store %arg7[%c0_42, %c0_43, %c0_44], %92 {strides = array<i32>} : memref<1x1x8xf32, #tpu.memory_space<vmem>>, vector<1x1x8xf32>,
    return
  }
  func.func @transform_0(%arg0: i32, %arg1: i32) -> (i32, i32) {
    %c0_i32 = arith.constant 0 : i32
    %c0_i32_0 = arith.constant 0 : i32
    return %arg0, %c0_i32 : i32, i32
  }
  func.func @transform_1(%arg0: i32, %arg1: i32) -> (i32, i32) {
    %c0_i32 = arith.constant 0 : i32
    %c0_i32_0 = arith.constant 0 : i32
    %c0_i32_1 = arith.constant 0 : i32
    return %c0_i32, %c0_i32_0 : i32, i32
  }
  func.func @transform_2(%arg0: i32, %arg1: i32) -> (i32, i32) {
    %c0_i32 = arith.constant 0 : i32
    %c0_i32_0 = arith.constant 0 : i32
    %c0_i32_1 = arith.constant 0 : i32
    return %c0_i32, %c0_i32_0 : i32, i32
  }
  func.func @transform_3(%arg0: i32, %arg1: i32) -> (i32, i32) {
    %c0_i32 = arith.constant 0 : i32
    %c0_i32_0 = arith.constant 0 : i32
    %c0_i32_1 = arith.constant 0 : i32
    return %c0_i32, %c0_i32_0 : i32, i32
  }
  func.func @transform_4(%arg0: i32, %arg1: i32) -> (i32, i32) {
    %c0_i32 = arith.constant 0 : i32
    %c0_i32_0 = arith.constant 0 : i32
    %c0_i32_1 = arith.constant 0 : i32
    return %c0_i32, %c0_i32_0 : i32, i32
  }
  func.func @transform_5(%arg0: i32, %arg1: i32) -> (i32, i32, i32) {
    %c0_i32 = arith.constant 0 : i32
    %c0_i32_0 = arith.constant 0 : i32
    %c0_i32_1 = arith.constant 0 : i32
    return %arg0, %c0_i32, %c0_i32_0 : i32, i32, i32
  }
}

</mosaic_0001>

<bundles_post_ra>
// kernel: tpu_custom_call.1
= control target key start
LH: loop header
LB: loop body
LE: loop exit
PB: predicated region body
PF: predicated region fallthrough
CT: control target
= control target key end

     0   :  { %10 = vsyncpa [#allocation4], 0  ;;  %s612_s0 = inlined_call_operand.vmem [shape: f32[8,128], index: 0, kind: input, shape index: {}]   ;;  %s613_s1 = inlined_call_operand.hbm [shape: f32[128,256], index: 1, kind: input, shape index: {}]   ;;  %s614_s2 = inlined_call_operand.vmem [shape: f32[64,32], index: 2, kind: input, shape index: {}]   ;;  %s615_s3 = inlined_call_operand.vmem [shape: f32[3,64], index: 3, kind: input, shape index: {}]   ;;  %s616_s4 = inlined_call_operand.vmem [shape: f32[5,32], index: 4, kind: input, shape index: {}]   ;;  %s617_s5 = inlined_call_operand.hbm [shape: f32[1,1,8], index: 5, kind: output, shape index: {}]  }
   0x1   :  { %11 = vsyncpa [#allocation5], 0  ;;  %s491_s18 = smov [#allocation3]   ;;  %s443_s22 = scalar_lea.hbm %s613_s1, 4096 }
   0x2   :  { %s19_s19 = sshll.u32 %s491_s18, 4  ;;  %p444_p0 = scmp.ne.s32.totalorder %s613_s1, %s443_s22  ;;  %s20_s19 = int_to_ptr.vmem [resolvable:$true] %s19_s19 }
   0x3   :  { %p447_p1 = scmp.lt.u32.totalorder %s443_s22, %s613_s1 }
   0x5   :  { %p449_p2 = pnand %p447_p1, %p444_p0 }
   0x7   :  { %452 = shalt.err (!%p449_p2)
}
   0x8   :  { %s453_s27 = scalar_lea.vmem %s20_s19, 4096  ;;  %p458_p4 = scmp.lt.s32.totalorder %s20_s19, %s20_s19 }
   0x9   :  { %p454_p3 = scmp.ne.s32.totalorder %s20_s19, %s453_s27  ;;  %p459_p5 = scmp.lt.s32.totalorder %s453_s27, %s453_s27 }
   0xb   :  { %p460_p6 = por %p459_p5, %p458_p4 }
   0xd   :  { %p461_p7 = pnand %p460_p6, %p454_p3 }
   0xf   :  { %464 = shalt.err (!%p461_p7)
}
  0x10   :  { %s492_s28 = smov 256   ;;  %s493_s29 = smov 16  }
  0x11   :  { %25 = dma.hbm_to_vmem [thread:$0]  %s613_s1, 4096, %s20_s19, [#allocation4], %s492_s28, %s492_s28, %s493_s29  }
  0x12   :  { %487 = dma.done.wait [#allocation4], 4096  }
  0x13   :  { %488 = vsyncadd [#allocation4], 4294963200  ;;  %v494_v0 = vmov 0.0   ;;  %v37_v1 = vld [vmem:[#allocation3 + $0x8] sm:$0xff]  ;;  %v39_v2 = vld [vmem:[#allocation3 + $0x18] sm:$0xff]  ;;  %vm152_vm0 = vcmask 523264  }
  0x14   :  { %132 = vmatprep.mubr.f32.mxu0 %v494_v0  ;;  %v36_v3 = vld [vmem:[#allocation3] sm:$0xff]  ;;  %v382_v4 = vpack.c.bf16 %v39_v2, %v37_v1  ;;  %v38_v5 = vld [vmem:[#allocation3 + $0x10] sm:$0xff]  ;;  %v41_v6 = vld [vmem:[#allocation3 + $0x28] sm:$0xff]  ;;  %v495_v1 = vmov 0.0|0.0   ;;  %vm496_vm1 = vmmov 0   ;;  %vm142_vm2 = vcmask 7168  }
  0x15   :  { %v43_v7 = vld [vmem:[#allocation3 + $0x38] sm:$0xff]  ;;  %v384_v8 = vpack.c.bf16 %v38_v5, %v36_v3  ;;  %v40_v10 = vld [vmem:[#allocation3 + $0x20] sm:$0xff]  ;;  %v42_v11 = vld [vmem:[#allocation3 + $0x30] sm:$0xff]  ;;  %414 = vmatprep.subr.bf16.mxu1 %v495_v1  ;;  %379 = vmatprep.mubr.msk.f32.mxu1 %vm496_vm1, %v494_v0  ;;  %vm270_vm3 = vcmask 261120   ;;  %s498_s10 = smov [#allocation6]   ;;  %vm328_vm4 = vcmask 57344  }
  0x16   :  { %v386_v9 = vpack.c.bf16 %v43_v7, %v41_v6  ;;  %v45_v12 = vld [vmem:[#allocation3 + $0x48] sm:$0xff]  ;;  %383 = vmatprep.subr.bf16.mxu0 %v382_v4  ;;  %v47_v13 = vld [vmem:[#allocation3 + $0x58] sm:$0xff]  ;;  %v388_v14 = vpack.c.bf16 %v42_v11, %v40_v10  ;;  %v44_v16 = vld [vmem:[#allocation3 + $0x40] sm:$0xff]  ;;  %s336_s11 = sshll.u32 %s498_s10, 4  ;;  %s337_s11 = int_to_ptr.vmem [resolvable:$true] %s336_s11 }
  0x17   :  { %385 = vmatpush1.bf16.msra.mxu0 %v384_v8  ;;  %v390_v15 = vpack.c.bf16 %v47_v13, %v45_v12  ;;  %v46_v17 = vld [vmem:[#allocation3 + $0x50] sm:$0xff]  ;;  %v49_v18 = vld [vmem:[#allocation3 + $0x68] sm:$0xff]  ;;  %v51_v19 = vld [vmem:[#allocation3 + $0x78] sm:$0xff]  ;;  %s465_s12 = scalar_lea.vmem %s337_s11, 16  ;;  %s469_s13 = scalar_lea.vmem %s337_s11, 32 }
  0x18   :  { %387 = vmatprep.subr.bf16.mxu0 %v386_v9  ;;  %v392_v20 = vpack.c.bf16 %v46_v17, %v44_v16  ;;  %v394_v21 = vpack.c.bf16 %v51_v19, %v49_v18  ;;  %v48_v22 = vld [vmem:[#allocation3 + $0x60] sm:$0xff]  ;;  %v50_v23 = vld [vmem:[#allocation3 + $0x70] sm:$0xff]  ;;  %v53_v24 = vld [vmem:[#allocation3 + $0x88] sm:$0xff]  ;;  %p466_p8 = scmp.ne.s32.totalorder %s337_s11, %s465_s12  ;;  %p470_p9 = scmp.lt.s32.totalorder %s337_s11, %s337_s11 }
  0x19   :  { %v55_v25 = vld [vmem:[#allocation3 + $0x98] sm:$0xff]  ;;  %v396_v26 = vpack.c.bf16 %v50_v23, %v48_v22  ;;  %v52_v28 = vld [vmem:[#allocation3 + $0x80] sm:$0xff]  ;;  %v54_v29 = vld [vmem:[#allocation3 + $0x90] sm:$0xff]  ;;  %p471_p10 = scmp.lt.s32.totalorder %s469_s13, %s465_s12 }
  0x1a   :  { %v398_v27 = vpack.c.bf16 %v55_v25, %v53_v24  ;;  %v57_v30 = vld [vmem:[#allocation3 + $0xa8] sm:$0xff]  ;;  %v59_v31 = vld [vmem:[#allocation3 + $0xb8] sm:$0xff]  ;;  %v400_v32 = vpack.c.bf16 %v54_v29, %v52_v28  ;;  %v56_v34 = vld [vmem:[#allocation3 + $0xa0] sm:$0xff] }
  0x1b   :  { %389 = vmatpush1.bf16.msra.mxu0 %v388_v14  ;;  %v402_v33 = vpack.c.bf16 %v59_v31, %v57_v30  ;;  %v58_v35 = vld [vmem:[#allocation3 + $0xb0] sm:$0xff]  ;;  %v61_v36 = vld [vmem:[#allocation3 + $0xc8] sm:$0xff]  ;;  %v63_v37 = vld [vmem:[#allocation3 + $0xd8] sm:$0xff]  ;;  %p472_p11 = por %p471_p10, %p470_p9 }
  0x1c   :  { %391 = vmatprep.subr.bf16.mxu0 %v390_v15  ;;  %v404_v38 = vpack.c.bf16 %v58_v35, %v56_v34  ;;  %v406_v39 = vpack.c.bf16 %v63_v37, %v61_v36  ;;  %v60_v40 = vld [vmem:[#allocation3 + $0xc0] sm:$0xff]  ;;  %v62_v41 = vld [vmem:[#allocation3 + $0xd0] sm:$0xff]  ;;  %v65_v42 = vld [vmem:[#allocation3 + $0xe8] sm:$0xff] }
  0x1d   :  { %v67_v43 = vld [vmem:[#allocation3 + $0xf8] sm:$0xff]  ;;  %v408_v44 = vpack.c.bf16 %v62_v41, %v60_v40  ;;  %v64_v46 = vld [vmem:[#allocation3 + $0xe0] sm:$0xff]  ;;  %v66_v47 = vld [vmem:[#allocation3 + $0xf0] sm:$0xff]  ;;  %p473_p12 = pnand %p472_p11, %p466_p8 }
  0x1e   :  { %v410_v45 = vpack.c.bf16 %v67_v43, %v65_v42  ;;  %v412_v48 = vpack.c.bf16 %v66_v47, %v64_v46  ;;  %v35_v49 = vld [vmem:[%s612_s0] sm:$0xff]  ;;  %v183_v62 = vld [vmem:[%s614_s2 + $0x8] sm:$0xff]  ;;  %v184_v63 = vld [vmem:[%s614_s2 + $0x10] sm:$0xff] }
  0x1f   :  { %393 = vmatpush1.bf16.msra.mxu0 %v392_v20  ;;  %v345_v50 = vld [vmem:[%s615_s3] ss:$0 sm:$0xff]  ;;  %v185_v3 = vld [vmem:[%s614_s2 + $0x18] sm:$0xff]  ;;  %v187_v6 = vld [vmem:[%s614_s2 + $0x28] sm:$0xff] }
  0x20   :  { %395 = vmatprep.subr.bf16.mxu0 %v394_v21  ;;  %v182_v61 = vld [vmem:[%s614_s2] sm:$0xff]  ;;  %v418_v4 = vpack.c.bf16 %v185_v3, %v184_v63  ;;  %v188_v8 = vld [vmem:[%s614_s2 + $0x30] sm:$0xff]  ;;  %v189_v0 = vld [vmem:[%s614_s2 + $0x38] sm:$0xff] }
  0x21   :  { %v415_v2 = vpack.c.bf16 %v183_v62, %v182_v61  ;;  %v186_v5 = vld [vmem:[%s614_s2 + $0x20] sm:$0xff]  ;;  %v424_v9 = vpack.c.bf16 %v189_v0, %v188_v8 }
  0x22   :  { %v421_v7 = vpack.c.bf16 %v187_v6, %v186_v5  ;;  %v346_v15 = vld [vmem:[%s615_s3 + $0x1] ss:$0 sm:$0xff]  ;;  %v347_v17 = vld [vmem:[%s615_s3 + $0x2] ss:$0 sm:$0xff]  ;;  %v348_v25 = vld [vmem:[%s616_s4] ss:$0 sm:$0xff] }
  0x23   :  { %397 = vmatpush1.bf16.msra.mxu0 %v396_v26  ;;  %416 = vmatpush3.bf16.msra.mxu1 %v415_v2  ;;  %v351_v41 = vld [vmem:[%s616_s4 + $0x2] ss:$0 sm:$0xff] }
  0x24   :  { %399 = vmatprep.subr.bf16.mxu0 %v398_v27  ;;  %417 = vmatprep.subr.bf16.mxu1 %v495_v1 }
  0x27   :  { %401 = vmatpush1.bf16.msra.mxu0 %v400_v32  ;;  %419 = vmatpush3.bf16.msra.mxu1 %v418_v4 }
  0x28   :  { %403 = vmatprep.subr.bf16.mxu0 %v402_v33  ;;  %420 = vmatprep.subr.bf16.mxu1 %v495_v1 }
  0x2b   :  { %405 = vmatpush1.bf16.msra.mxu0 %v404_v38  ;;  %422 = vmatpush3.bf16.msra.mxu1 %v421_v7 }
  0x2c   :  { %407 = vmatprep.subr.bf16.mxu0 %v406_v39  ;;  %423 = vmatprep.subr.bf16.mxu1 %v495_v1  ;;  %v350_v39 = vld [vmem:[%s616_s4 + $0x1] ss:$0 sm:$0xff] }
  0x2f   :  { %409 = vmatpush1.bf16.msra.mxu0 %v408_v44  ;;  %425 = vmatpush3.bf16.msra.mxu1 %v424_v9 }
  0x30   :  { %411 = vmatprep.subr.bf16.mxu0 %v410_v45 }
  0x33   :  { %413 = vmatpush1.bf16.msra.mxu0 %v412_v48  ;;  %v352_v48 = vld [vmem:[%s616_s4 + $0x3] ss:$0 sm:$0xff] }
  0x36   :  { %133 = vmatmul.mubr.f32.vlgmr.msra.gmra.mrb[0].mxu0 %v35_v49 }
 0x109   :  { %v134_v51 = vpop.f32.mrb[0].mxu0 }
 0x10a   :  { %v136_v52 = vpop.f32.mrb[1].mxu0  ;;  %v139_v60 = vmul.f32 %v134_v51, %v35_v49 }
 0x10b   :  { %v149_v53 = vadd.f32 %v345_v50, %v136_v52  ;;  %v497_v52 = vmov 0  }
 0x10c   :  { %434 = vset.pattern.permute.xlu0 %v497_v52 }
 0x10d   :  { %v153_v54 = vsel %vm152_vm0, %v149_v53, 0.0 }
 0x10e   :  { %154 = vadd.xlane.f32.xlu0 %v153_v54 }
 0x19b   :  { %v155_v55 = vpop.xlane.xlu0 %154 }
 0x19c   :  { %v157_v56 = vmul.f32 0.015625, %v155_v55 }
 0x19e   :  { %v158_v57 = vsub.f32 %v149_v53, %v157_v56  ;;  %v353_v53 = vld [vmem:[%s616_s4 + $0x4] ss:$0 sm:$0xff] }
 0x1a0   :  { %v159_v58 = vmul.f32 %v158_v57, %v158_v57 }
 0x1a2   :  { %v160_v59 = vsel %vm152_vm0, %v159_v58, 0.0  ;;  %v321_v58 = vlaneseq }
 0x1a3   :  { %161 = vadd.xlane.f32.xlu0 %v160_v59 }
 0x1a4   :  { %v322_v59 = vand.u32 127, %v321_v58 }
 0x1a7   :  { %140 = vadd.xlane.f32.xlu0 %v139_v60  ;;  %v324_v60 = vshrl.u32 %v321_v58, 7 }
 0x1a9   :  { %v325_v61 = vsub.s32 %v322_v59, %v324_v60 }
 0x230   :  { %v162_v10 = vpop.xlane.xlu0 %161 }
 0x231   :  { %v163_v11 = vmul.f32 0.015625, %v162_v10 }
 0x233   :  { %v164_v12 = vadd.f32 1e-05, %v163_v11 }
 0x234   :  { %v141_v13 = vpop.xlane.xlu0 %140 }
 0x235   :  { %435 = vrsqrt.f32 %v164_v12  ;;  %143 = vst.msk [vmem:[#allocation2] sm:$0xff] %vm142_vm2, %v141_v13 }
 0x23c   :  { %v309_v55 = vld [vmem:[#allocation2] sm:$0xff] }
 0x23f   :  { %v436_v14 = vpop.eup %435 }
 0x240   :  { %v166_v16 = vmul.f32 %v436_v14, %v158_v57 }
 0x242   :  { %v171_v18 = vmul.f32 %v346_v15, %v166_v16 }
 0x244   :  { %v176_v19 = vadd.f32 %v347_v17, %v171_v18 }
 0x246   :  { %v178_v20 = vmul.f32 0.70710677, %v176_v19  ;;  %v177_v22 = vmul.f32 0.5, %v176_v19 }
 0x248   :  { %437 = verf.f32 %v178_v20 }
 0x252   :  { %v438_v21 = vpop.eup %437 }
 0x253   :  { %v180_v23 = vadd.f32 1.0, %v438_v21 }
 0x255   :  { %v181_v24 = vmul.f32 %v180_v23, %v177_v22 }
 0x257   :  { %380 = vmatmul.mubr.msk.f32.vlgmr.msra.gmra.mrb[0].mxu1 %vm152_vm0, %v181_v24 }
 0x32a   :  { %v264_v26 = vpop.f32.mrb[0].mxu1 }
 0x32b   :  { %v265_v27 = vadd.f32 %v348_v25, %v264_v26  ;;  %v381_v28 = vpop.f32.mrb[1].mxu1 }
 0x32d   :  { %v271_v29 = vsel %vm270_vm3, %v265_v27, 0.0 }
 0x32e   :  { %272 = vadd.xlane.f32.xlu1 %v271_v29 }
 0x3bb   :  { %v273_v30 = vpop.xlane.xlu1 %272 }
 0x3bc   :  { %v275_v31 = vmul.f32 0.03125, %v273_v30 }
 0x3be   :  { %v276_v32 = vsub.f32 %v265_v27, %v275_v31 }
 0x3c0   :  { %v277_v33 = vmul.f32 %v276_v32, %v276_v32 }
 0x3c2   :  { %v278_v34 = vsel %vm270_vm3, %v277_v33, 0.0 }
 0x3c3   :  { %279 = vadd.xlane.f32.xlu1 %v278_v34 }
 0x450   :  { %v280_v35 = vpop.xlane.xlu1 %279 }
 0x451   :  { %v281_v36 = vmul.f32 0.03125, %v280_v35 }
 0x453   :  { %v282_v37 = vadd.f32 1e-05, %v281_v36 }
 0x455   :  { %439 = vrsqrt.f32 %v282_v37 }
 0x45f   :  { %v440_v38 = vpop.eup %439 }
 0x460   :  { %v284_v40 = vmul.f32 %v440_v38, %v276_v32 }
 0x462   :  { %v289_v42 = vmul.f32 %v350_v39, %v284_v40 }
 0x464   :  { %v294_v43 = vadd.f32 %v351_v41, %v289_v42 }
 0x466   :  { %v296_v44 = vmul.f32 0.70710677, %v294_v43  ;;  %v295_v46 = vmul.f32 0.5, %v294_v43 }
 0x468   :  { %441 = verf.f32 %v296_v44 }
 0x472   :  { %v442_v45 = vpop.eup %441 }
 0x473   :  { %v298_v47 = vadd.f32 1.0, %v442_v45 }
 0x475   :  { %v299_v49 = vmul.f32 %v298_v47, %v295_v46 }
 0x477   :  { %v305_v50 = vmul.f32 %v352_v48, %v299_v49 }
 0x479   :  { %v306_v51 = vsel %vm270_vm3, %v305_v50, 0.0 }
 0x47a   :  { %307 = vadd.xlane.f32.xlu1 %v306_v51 }
 0x507   :  { %v308_v54 = vpop.xlane.xlu1 %307 }
 0x508   :  { %v310_v56 = vadd.f32 %v309_v55, %v308_v54 }
 0x50a   :  { %v316_v57 = vadd.f32 %v353_v53, %v310_v56 }
 0x50c   :  { %319 = vperm.xlu0 %434, %v316_v57  }
 0x58b   :  { %v320_v62 = vpop.permute.xlu0 %319 }
 0x58c   :  { %v326_v63 = vrot.slane %v320_v62, %v325_v61 }
 0x58e   :  { %329 = vst.msk [vmem:[#allocation6] sm:$0x1] %vm328_vm4, %v326_v63 }
 0x58f   :  { %476 = shalt.err (!%p473_p12)
}
 0x590   :  { %s477_s15 = scalar_lea.hbm %s617_s5, 16 }
 0x591   :  { %p478_p13 = scmp.ne.s32.totalorder %s617_s5, %s477_s15  ;;  %p481_p0 = scmp.lt.u32.totalorder %s477_s15, %s617_s5 }
 0x593   :  { %p483_p1 = pnand %p481_p0, %p478_p13 }
 0x595   :  { %486 = shalt.err (!%p483_p1)
}
 0x596   :  { %339 = dma.vmem_to_hbm [thread:$0]  %s337_s11, 16, %s617_s5, [#allocation5]  }
 0x597   :  { %489 = dma.done.wait [#allocation5], 16  }
 0x598   :  { %490 = vsyncadd [#allocation5], 4294967280 }
 0x599   :  { %343 = vsyncpa [#allocation4], 1 }
 0x59a   :  { %344 = vsyncpa [#allocation5], 1 }

</bundles_post_ra>
